<compile_context>
chip_gen: v7x
topology: tpu7x:2x2x1
jax: 0.10.0
libtpu: 0.0.40
codegen_flags: <defaults>
</compile_context>

<pallas_src>
import math

import jax
import jax.numpy as jnp
from jax.experimental import pallas as pl
from jax.experimental.pallas import tpu as pltpu


# ----------------------------------------------------------------------------
# Pallas kernel: fused identity passthrough of the packed parameter buffer.
# ----------------------------------------------------------------------------
def _passthrough_kernel(p_ref, o_ref):
    o_ref[...] = p_ref[...]


def _fused_passthrough(packed: jax.Array) -> jax.Array:
    """Copy the packed (1, L) parameter buffer through one Pallas kernel.

    L is a multiple of 128 (lane-dense) and the whole buffer is a single
    full-array block, so this lowers to one unmasked DMA in / one DMA out.
    """
    r, c = packed.shape
    return pl.pallas_call(
        _passthrough_kernel,
        out_shape=jax.ShapeDtypeStruct((r, c), packed.dtype),
        grid=(1,),
        in_specs=[pl.BlockSpec((r, c), lambda i: (0, 0))],
        out_specs=pl.BlockSpec((r, c), lambda i: (0, 0)),
        compiler_params=pltpu.CompilerParams(
            dimension_semantics=("arbitrary",),
        ),
    )(packed)


# ----------------------------------------------------------------------------
# TemporalParams equivalent
# ----------------------------------------------------------------------------
class TemporalParams:
    """JAX/Pallas equivalent of moai's TemporalParams.

    parameters: dict of {name: {"shape": tuple, "init": "zeros"|"ones"|"randn"}}
    window_size: number of frames; one parameter per (name, frame).
    """

    _LANE = 128

    def __init__(self, parameters: dict, window_size, key=None):
        window_size = int(window_size) if isinstance(window_size, str) else window_size
        self.window_size = window_size

        if key is None:
            key = jax.random.PRNGKey(0)

        # Pack every (name, frame) parameter into one lane-dense flat buffer.
        # Each segment is padded to a multiple of 128 so slices start at lane
        # boundaries and the total width is lane-dense.
        self._segments = []  # (key_name, orig_shape, offset, size)
        flat_parts = []
        offset = 0
        for name, cfg in parameters.items():
            shape = tuple(cfg["shape"])
            init = cfg.get("init", "zeros")
            size = math.prod(shape)
            padded = ((size + self._LANE - 1) // self._LANE) * self._LANE
            for i in range(window_size):
                if init == "zeros":
                    flat = jnp.zeros((size,), dtype=jnp.float32)
                elif init == "ones":
                    flat = jnp.ones((size,), dtype=jnp.float32)
                elif init == "randn":
                    key, sub = jax.random.split(key)
                    flat = jax.random.normal(sub, (size,), dtype=jnp.float32)
                else:
                    # TODO(synk): other torch init factories not mapped here.
                    flat = jnp.zeros((size,), dtype=jnp.float32)
                if padded > size:
                    flat = jnp.concatenate(
                        [flat, jnp.zeros((padded - size,), dtype=jnp.float32)]
                    )
                flat_parts.append(flat)
                self._segments.append((str(name) + str(i), shape, offset, size))
                offset += padded

        total = max(offset, self._LANE)
        packed = jnp.concatenate(flat_parts) if flat_parts else jnp.zeros(
            (total,), dtype=jnp.float32
        )
        if packed.shape[0] < total:
            packed = jnp.concatenate(
                [packed, jnp.zeros((total - packed.shape[0],), dtype=jnp.float32)]
            )
        # Lane-dense 2D layout: (1, L) with L a multiple of 128.
        # NOTE: for very large parameter sets (multi-MiB) this single block
        # should be re-tiled along a grid axis to respect v7x VMEM limits.
        self._packed = packed.reshape(1, total)

    def forward(self, void: jax.Array) -> dict:
        # `void` is ignored, exactly as in the PyTorch forward.
        del void
        copied = _fused_passthrough(self._packed)  # one Pallas launch, one DMA
        flat = copied[0]
        out = {}
        for key_name, shape, offset, size in self._segments:
            # Static slices (compile-time offsets) + reshape; strips lane pad.
            out[key_name] = flat[offset:offset + size].reshape(shape)
        return out

    __call__ = forward


# ----------------------------------------------------------------------------
# Demo / smoke test
# ----------------------------------------------------------------------------
if __name__ == "__main__":
    key = jax.random.PRNGKey(0)

    # Small config consistent with typical temporal-parameter usage
    # (e.g. per-frame pose / shape / translation parameters).
    parameters = {
        "pose":   {"shape": (1, 72), "init": "zeros"},
        "betas":  {"shape": (1, 10), "init": "ones"},
        "transl": {"shape": (1, 3),  "init": "randn"},
    }
    window_size = 4

    module = TemporalParams(parameters, window_size, key=key)

    # The forward's input is unused ("void"); pick something SMALL.
    void = jax.random.normal(jax.random.PRNGKey(0), (2, 4, 16, 16), dtype=jnp.float32)

    result = module(void)
    jax.block_until_ready(jax.tree_util.tree_leaves(result))

    # Sanity checks: names, shapes, and that the Pallas passthrough is exact.
    expected_names = {f"{n}{i}" for n in parameters for i in range(window_size)}
    assert set(result.keys()) == expected_names, "parameter name mismatch"

    packed_flat = module._packed[0]
    for key_name, shape, offset, size in module._segments:
        got = result[key_name]
        assert got.shape == tuple(shape), "shape mismatch"
        ref = packed_flat[offset:offset + size].reshape(shape)
        assert jnp.array_equal(got, ref), "passthrough mismatch"

    # Explicit init checks.
    for i in range(window_size):
        assert jnp.array_equal(result[f"pose{i}"], jnp.zeros((1, 72), jnp.float32))
        assert jnp.array_equal(result[f"betas{i}"], jnp.ones((1, 10), jnp.float32))

    print("KERNEL_OK")
</pallas_src>

<mosaic_0001>
module attributes {stable_mosaic.version = 11 : i64} {
  func.func @_passthrough_kernel(%arg0: i32, %arg1: memref<1x1536xf32, #tpu.memory_space<vmem>>, %arg2: memref<1x1536xf32, #tpu.memory_space<vmem>>) attributes {dimension_semantics = [#tpu.dimension_semantics<arbitrary>], iteration_bounds = array<i64: 1>, scalar_prefetch = 0 : i64, scratch_operands = 0 : i64, tpu.core_type = #tpu.core_type<tc>, window_params = [{pipeline_mode = #tpu.pipeline_mode<synchronous>, transform_indices = @transform_0, window_bounds = array<i64: 1, 1536>}, {pipeline_mode = #tpu.pipeline_mode<synchronous>, transform_indices = @transform_1, window_bounds = array<i64: 1, 1536>}]} {
    %c0 = arith.constant 0 : index
    %c0_0 = arith.constant 0 : index
    %0 = vector.load %arg1[%c0, %c0_0] : memref<1x1536xf32, #tpu.memory_space<vmem>>, vector<1x1536xf32>
    %c0_1 = arith.constant 0 : index
    %c0_2 = arith.constant 0 : index
    %1 = vector.load %arg2[%c0_1, %c0_2] : memref<1x1536xf32, #tpu.memory_space<vmem>>, vector<1x1536xf32>
    tpu.vector_store %arg2[%c0_1, %c0_2], %0 {strides = array<i32>} : memref<1x1536xf32, #tpu.memory_space<vmem>>, vector<1x1536xf32>,
    return
  }
  func.func @transform_0(%arg0: i32) -> (i32, i32) {
    %c0_i32 = arith.constant 0 : i32
    %c0_i32_0 = arith.constant 0 : i32
    %c0_i32_1 = arith.constant 0 : i32
    return %c0_i32, %c0_i32_0 : i32, i32
  }
  func.func @transform_1(%arg0: i32) -> (i32, i32) {
    %c0_i32 = arith.constant 0 : i32
    %c0_i32_0 = arith.constant 0 : i32
    %c0_i32_1 = arith.constant 0 : i32
    return %c0_i32, %c0_i32_0 : i32, i32
  }
}

</mosaic_0001>

<bundles_post_ra>
// kernel: tpu_custom_call.1
= control target key start
LH: loop header
LB: loop body
LE: loop exit
PB: predicated region body
PF: predicated region fallthrough
CT: control target
= control target key end

     0   :  { %6 = vsyncpa [#allocation3], 0  ;;  %s130_s0 = inlined_call_operand.hbm [shape: f32[1,1536], index: 0, kind: input, shape index: {}]   ;;  %s131_s1 = inlined_call_operand.hbm [shape: f32[1,1536], index: 1, kind: output, shape index: {}]  }
   0x1   :  { %7 = vsyncpa [#allocation4], 0  ;;  %s94_s6 = smov [#allocation2]   ;;  %s46_s10 = scalar_lea.hbm %s130_s0, 192 }
   0x2   :  { %s14_s7 = sshll.u32 %s94_s6, 4  ;;  %p47_p0 = scmp.ne.s32.totalorder %s130_s0, %s46_s10  ;;  %s15_s7 = int_to_ptr.vmem [resolvable:$true] %s14_s7 }
   0x3   :  { %p50_p1 = scmp.lt.u32.totalorder %s46_s10, %s130_s0 }
   0x5   :  { %p52_p2 = pnand %p50_p1, %p47_p0 }
   0x7   :  { %55 = shalt.err (!%p52_p2)
}
   0x8   :  { %s56_s15 = scalar_lea.vmem %s15_s7, 192  ;;  %p61_p4 = scmp.lt.s32.totalorder %s15_s7, %s15_s7 }
   0x9   :  { %p57_p3 = scmp.ne.s32.totalorder %s15_s7, %s56_s15  ;;  %p62_p5 = scmp.lt.s32.totalorder %s56_s15, %s56_s15 }
   0xb   :  { %p63_p6 = por %p62_p5, %p61_p4 }
   0xd   :  { %p64_p7 = pnand %p63_p6, %p57_p3 }
   0xf   :  { %67 = shalt.err (!%p64_p7)
}
  0x10   :  { %17 = dma.hbm_to_vmem [thread:$0]  %s130_s0, 192, %s15_s7, [#allocation3]  }
  0x11   :  { %90 = dma.done.wait [#allocation3], 192  }
  0x12   :  { %91 = vsyncadd [#allocation3], 4294967104  ;;  %v24_v0 = vlaneseq  ;;  %s95_s18 = smov [#allocation5]   ;;  %v21_v1 = vld [vmem:[#allocation2] sm:$0xff]  ;;  %v22_v2 = vld [vmem:[#allocation2 + $0x8] sm:$0xf] }
  0x13   :  { %s35_s19 = sshll.u32 %s95_s18, 4  ;;  %23 = vst [vmem:[#allocation5] sm:$0xff] %v21_v1  ;;  %s36_s19 = int_to_ptr.vmem [resolvable:$true] %s35_s19 }
  0x14   :  { %vm26_vm0 = vcmp.lt.s32.totalorder %v24_v0, 512  ;;  %s68_s20 = scalar_lea.vmem %s36_s19, 192  ;;  %p73_p9 = scmp.lt.s32.totalorder %s36_s19, %s36_s19 }
  0x15   :  { %28 = vst.msk [vmem:[#allocation5 + $0x8] sm:$0xf] %vm26_vm0, %v22_v2  ;;  %p69_p8 = scmp.ne.s32.totalorder %s36_s19, %s68_s20  ;;  %p74_p10 = scmp.lt.s32.totalorder %s68_s20, %s68_s20 }
  0x17   :  { %p75_p11 = por %p74_p10, %p73_p9 }
  0x19   :  { %p76_p12 = pnand %p75_p11, %p69_p8 }
  0x1b   :  { %79 = shalt.err (!%p76_p12)
}
  0x1c   :  { %s80_s22 = scalar_lea.hbm %s131_s1, 192 }
  0x1d   :  { %p81_p13 = scmp.ne.s32.totalorder %s131_s1, %s80_s22  ;;  %p84_p0 = scmp.lt.u32.totalorder %s80_s22, %s131_s1 }
  0x1f   :  { %p86_p1 = pnand %p84_p0, %p81_p13 }
  0x21   :  { %89 = shalt.err (!%p86_p1)
}
  0x22   :  { %38 = dma.vmem_to_hbm [thread:$0]  %s36_s19, 192, %s131_s1, [#allocation4]  }
  0x23   :  { %92 = dma.done.wait [#allocation4], 192  }
  0x24   :  { %93 = vsyncadd [#allocation4], 4294967104 }
  0x25   :  { %42 = vsyncpa [#allocation3], 1 }
  0x26   :  { %43 = vsyncpa [#allocation4], 1 }

</bundles_post_ra>
